<compile_context>
chip_gen: v6e
topology: v6e:2x2x1
jax: 0.10.0
libtpu: 0.0.40
codegen_flags: <defaults>
</compile_context>

<pallas_src>
import jax
import jax.numpy as jnp
from jax.experimental import pallas as pl
from jax.experimental.pallas import tpu as pltpu


def _banded_weights(w_dh, W):
    """Banded matrix for one kernel-row dh.

    w_dh: (3, Cin, Cout) HWIO slice w[dh].  Returns B of shape
    ((W+2)*Cin, W*Cout) such that for a zero-padded row-planar row
    xpad_row of shape ((W+2)*Cin,):
        (xpad_row @ B)[w*Cout + co] = sum_{dw, ci} xpad[(w+dw)*Cin + ci] * w_dh[dw, ci, co]
    i.e. the dw taps of a 'SAME' 3x3 conv along W.
    """
    _, Cin, Cout = w_dh.shape
    B = jnp.zeros(((W + 2) * Cin, W * Cout), w_dh.dtype)
    idx = jnp.arange(W)
    for dw in range(3):
        sel = jnp.zeros((W + 2, W), w_dh.dtype).at[idx + dw, idx].set(1.0)
        B = B + jnp.kron(sel, w_dh[dw])          # block (w+dw, w) <- w_dh[dw]
    return B


def up_block_forward(up_x, skip_x, params):
    """UpBlock.forward. Inputs/outputs are NCHW (PyTorch convention)."""
    N, C_up, Hh, Wh = up_x.shape
    _, C_skip, H, W = skip_x.shape
    assert H == 2 * Hh and W == 2 * Wh
    w1, b1 = params["w1"], params["b1"]          # (3,3,Cin,Cout), (Cout,)
    w2, b2 = params["w2"], params["b2"]          # (3,3,Cout,Cout), (Cout,)
    Cout = w1.shape[-1]

    # ---- wrapper glue (small XLA ops on the pre-concat tensors) -------------
    # NCHW -> NHWC and nearest 2x upsample of the decoder branch only.
    up_nhwc = jnp.transpose(up_x, (0, 2, 3, 1))                      # (N,Hh,Wh,C_up)
    up2 = jnp.repeat(jnp.repeat(up_nhwc, 2, axis=1), 2, axis=2)      # (N,H,W,C_up)
    skip_nhwc = jnp.transpose(skip_x, (0, 2, 3, 1))                  # (N,H,W,C_skip)

    # Row-planar flattening (contiguous -> free reshape).
    up2_rp = up2.reshape(N, H, W * C_up)
    skip_rp = skip_nhwc.reshape(N, H, W * C_skip)

    # Split conv1 weights over the (virtual) concat and band them per dh.
    w1_up, w1_sk = w1[:, :, :C_up, :], w1[:, :, C_up:, :]
    wu = jnp.stack([_banded_weights(w1_up[dh], W) for dh in range(3)])   # (3,(W+2)*C_up, W*Cout)
    ws = jnp.stack([_banded_weights(w1_sk[dh], W) for dh in range(3)])   # (3,(W+2)*C_skip,W*Cout)
    wy = jnp.stack([_banded_weights(w2[dh], W) for dh in range(3)])      # (3,(W+2)*Cout, W*Cout)
    b1_row = jnp.tile(b1, W)[None, :]            # (1, W*Cout)
    b2_row = jnp.tile(b2, W)[None, :]            # (1, W*Cout)

    WCu, WCs, WCo = W * C_up, W * C_skip, W * Cout
    PCu, PCs, PCo = (W + 2) * C_up, (W + 2) * C_skip, (W + 2) * Cout

    # ---- fused kernel: pad + conv1 + ReLU + pad + conv2 + ReLU --------------
    def kernel(up2_ref, skip_ref, wu_ref, ws_ref, b1_ref, wy_ref, b2_ref,
               o_ref, upad, spad, ypad):
        # Zero-padded row-planar scratches (borders = the 'SAME' conv halo).
        upad[...] = jnp.zeros_like(upad)
        spad[...] = jnp.zeros_like(spad)
        ypad[...] = jnp.zeros_like(ypad)
        upad[1:H + 1, C_up:(W + 1) * C_up] = up2_ref[0]
        spad[1:H + 1, C_skip:(W + 1) * C_skip] = skip_ref[0]

        # conv1 (+bias, ReLU): 3 banded matmuls per input branch, f32 accum.
        acc1 = jnp.zeros((H, WCo), jnp.float32)
        for dh in range(3):
            acc1 = acc1 + jnp.dot(upad[dh:dh + H, :], wu_ref[dh],
                                  preferred_element_type=jnp.float32)
            acc1 = acc1 + jnp.dot(spad[dh:dh + H, :], ws_ref[dh],
                                  preferred_element_type=jnp.float32)
        y1 = jnp.maximum(acc1 + b1_ref[...], 0.0)
        # keep conv1 output (with halo) in VMEM for conv2 -- no HBM round trip
        ypad[1:H + 1, Cout:(W + 1) * Cout] = y1.astype(ypad.dtype)

        # conv2 (+bias, ReLU): 3 banded matmuls, lane-dense (H, W*Cout) store.
        acc2 = jnp.zeros((H, WCo), jnp.float32)
        for dh in range(3):
            acc2 = acc2 + jnp.dot(ypad[dh:dh + H, :], wy_ref[dh],
                                  preferred_element_type=jnp.float32)
        o_ref[0] = jnp.maximum(acc2 + b2_ref[...], 0.0).astype(o_ref.dtype)

    out_rp = pl.pallas_call(
        kernel,
        out_shape=jax.ShapeDtypeStruct((N, H, WCo), up_x.dtype),
        grid_spec=pltpu.PrefetchScalarGridSpec(
            num_scalar_prefetch=0,
            grid=(N,),
            in_specs=[
                pl.BlockSpec((1, H, WCu), lambda n: (n, 0, 0)),
                pl.BlockSpec((1, H, WCs), lambda n: (n, 0, 0)),
                pl.BlockSpec((3, PCu, WCo), lambda n: (0, 0, 0)),
                pl.BlockSpec((3, PCs, WCo), lambda n: (0, 0, 0)),
                pl.BlockSpec((1, WCo), lambda n: (0, 0)),
                pl.BlockSpec((3, PCo, WCo), lambda n: (0, 0, 0)),
                pl.BlockSpec((1, WCo), lambda n: (0, 0)),
            ],
            out_specs=pl.BlockSpec((1, H, WCo), lambda n: (n, 0, 0)),
            scratch_shapes=[
                pltpu.VMEM((H + 2, PCu), jnp.float32),   # padded upsampled branch
                pltpu.VMEM((H + 2, PCs), jnp.float32),   # padded skip branch
                pltpu.VMEM((H + 2, PCo), jnp.float32),   # padded conv1 output
            ],
        ),
        compiler_params=pltpu.CompilerParams(
            dimension_semantics=("parallel",)),
    )(up2_rp, skip_rp, wu, ws, b1_row, wy, b2_row)

    # (N, H, W*Cout) -> (N, H, W, Cout) is a free contiguous reshape; only the
    # final NHWC -> NCHW transpose remains as output glue.
    out = out_rp.reshape(N, H, W, Cout)
    return jnp.transpose(out, (0, 3, 1, 2))


def _reference(up_x, skip_x, params):
    """Plain-JAX reference for validation (lax conv, NHWC)."""
    up = jnp.repeat(jnp.repeat(up_x, 2, axis=2), 2, axis=3)
    x = jnp.concatenate([up, skip_x], axis=1)
    x = jnp.transpose(x, (0, 2, 3, 1))
    dn = jax.lax.conv_dimension_numbers(x.shape, params["w1"].shape,
                                        ("NHWC", "HWIO", "NHWC"))
    x = jax.lax.conv_general_dilated(x, params["w1"], (1, 1), "SAME",
                                     dimension_numbers=dn) + params["b1"]
    x = jnp.maximum(x, 0.0)
    x = jax.lax.conv_general_dilated(x, params["w2"], (1, 1), "SAME",
                                     dimension_numbers=dn) + params["b2"]
    x = jnp.maximum(x, 0.0)
    return jnp.transpose(x, (0, 3, 1, 2))


if __name__ == "__main__":
    key = jax.random.PRNGKey(0)
    k1, k2, k3, k4, kx, ks = jax.random.split(key, 6)

    # Small shapes implied by the forward pass:
    #   up_x   : (N=2, C_up=4,   H=8,  W=8)   -> upsampled to 16x16
    #   skip_x : (N=2, C_skip=4, H=16, W=16)
    N, C_up, C_skip, C_out = 2, 4, 4, 8
    C_in = C_up + C_skip

    params = {
        "w1": jax.random.normal(k1, (3, 3, C_in, C_out), jnp.float32) * 0.1,
        "b1": jax.random.normal(k2, (C_out,), jnp.float32) * 0.01,
        "w2": jax.random.normal(k3, (3, 3, C_out, C_out), jnp.float32) * 0.1,
        "b2": jax.random.normal(k4, (C_out,), jnp.float32) * 0.01,
    }

    up_x = jax.random.normal(kx, (N, C_up, 8, 8), jnp.float32)
    skip_x = jax.random.normal(ks, (N, C_skip, 16, 16), jnp.float32)

    out = jax.block_until_ready(up_block_forward(up_x, skip_x, params))
    ref = jax.block_until_ready(_reference(up_x, skip_x, params))

    assert out.shape == (N, C_out, 16, 16)
    assert jnp.allclose(out, ref, atol=1e-4, rtol=1e-4)

    print("KERNEL_OK")
</pallas_src>

<mosaic_0001>
module attributes {stable_mosaic.version = 11 : i64} {
  func.func @kernel(%arg0: i32, %arg1: memref<1x16x64xf32, #tpu.memory_space<vmem>>, %arg2: memref<1x16x64xf32, #tpu.memory_space<vmem>>, %arg3: memref<3x72x128xf32, #tpu.memory_space<vmem>>, %arg4: memref<3x72x128xf32, #tpu.memory_space<vmem>>, %arg5: memref<1x128xf32, #tpu.memory_space<vmem>>, %arg6: memref<3x144x128xf32, #tpu.memory_space<vmem>>, %arg7: memref<1x128xf32, #tpu.memory_space<vmem>>, %arg8: memref<1x16x128xf32, #tpu.memory_space<vmem>>, %arg9: memref<18x72xf32, #tpu.memory_space<vmem>>, %arg10: memref<18x72xf32, #tpu.memory_space<vmem>>, %arg11: memref<18x144xf32, #tpu.memory_space<vmem>>) attributes {dimension_semantics = [#tpu.dimension_semantics<parallel>], iteration_bounds = array<i64: 2>, scalar_prefetch = 0 : i64, scratch_operands = 3 : i64, tpu.core_type = #tpu.core_type<tc>, window_params = [{transform_indices = @transform_0, window_bounds = array<i64: 1, 16, 64>}, {transform_indices = @transform_1, window_bounds = array<i64: 1, 16, 64>}, {pipeline_mode = #tpu.pipeline_mode<synchronous>, transform_indices = @transform_2, window_bounds = array<i64: 3, 72, 128>}, {pipeline_mode = #tpu.pipeline_mode<synchronous>, transform_indices = @transform_3, window_bounds = array<i64: 3, 72, 128>}, {pipeline_mode = #tpu.pipeline_mode<synchronous>, transform_indices = @transform_4, window_bounds = array<i64: 1, 128>}, {pipeline_mode = #tpu.pipeline_mode<synchronous>, transform_indices = @transform_5, window_bounds = array<i64: 3, 144, 128>}, {pipeline_mode = #tpu.pipeline_mode<synchronous>, transform_indices = @transform_6, window_bounds = array<i64: 1, 128>}, {transform_indices = @transform_7, window_bounds = array<i64: 1, 16, 128>}]} {
    %cst = arith.constant 0.000000e+00 : f32
    %0 = vector.broadcast %cst : f32 to vector<18x72xf32>
    %c0 = arith.constant 0 : index
    %c0_0 = arith.constant 0 : index
    %1 = vector.load %arg9[%c0, %c0_0] : memref<18x72xf32, #tpu.memory_space<vmem>>, vector<18x72xf32>
    tpu.vector_store %arg9[%c0, %c0_0], %0 {strides = array<i32>} : memref<18x72xf32, #tpu.memory_space<vmem>>, vector<18x72xf32>,
    %cst_1 = arith.constant 0.000000e+00 : f32
    %2 = vector.broadcast %cst_1 : f32 to vector<18x72xf32>
    %c0_2 = arith.constant 0 : index
    %c0_3 = arith.constant 0 : index
    %3 = vector.load %arg10[%c0_2, %c0_3] : memref<18x72xf32, #tpu.memory_space<vmem>>, vector<18x72xf32>
    tpu.vector_store %arg10[%c0_2, %c0_3], %2 {strides = array<i32>} : memref<18x72xf32, #tpu.memory_space<vmem>>, vector<18x72xf32>,
    %cst_4 = arith.constant 0.000000e+00 : f32
    %4 = vector.broadcast %cst_4 : f32 to vector<18x144xf32>
    %c0_5 = arith.constant 0 : index
    %c0_6 = arith.constant 0 : index
    %5 = vector.load %arg11[%c0_5, %c0_6] : memref<18x144xf32, #tpu.memory_space<vmem>>, vector<18x144xf32>
    tpu.vector_store %arg11[%c0_5, %c0_6], %4 {strides = array<i32>} : memref<18x144xf32, #tpu.memory_space<vmem>>, vector<18x144xf32>,
    %c0_7 = arith.constant 0 : index
    %c0_8 = arith.constant 0 : index
    %c0_9 = arith.constant 0 : index
    %6 = vector.load %arg1[%c0_7, %c0_8, %c0_9] : memref<1x16x64xf32, #tpu.memory_space<vmem>>, vector<1x16x64xf32>
    %7 = vector.shape_cast %6 : vector<1x16x64xf32> to vector<16x64xf32>
    %c1 = arith.constant 1 : index
    %c4 = arith.constant 4 : index
    %8 = vector.load %arg9[%c1, %c4] : memref<18x72xf32, #tpu.memory_space<vmem>>, vector<16x64xf32>
    tpu.vector_store %arg9[%c1, %c4], %7 {strides = array<i32>} : memref<18x72xf32, #tpu.memory_space<vmem>>, vector<16x64xf32>,
    %c0_10 = arith.constant 0 : index
    %c0_11 = arith.constant 0 : index
    %c0_12 = arith.constant 0 : index
    %9 = vector.load %arg2[%c0_10, %c0_11, %c0_12] : memref<1x16x64xf32, #tpu.memory_space<vmem>>, vector<1x16x64xf32>
    %10 = vector.shape_cast %9 : vector<1x16x64xf32> to vector<16x64xf32>
    %c1_13 = arith.constant 1 : index
    %c4_14 = arith.constant 4 : index
    %11 = vector.load %arg10[%c1_13, %c4_14] : memref<18x72xf32, #tpu.memory_space<vmem>>, vector<16x64xf32>
    tpu.vector_store %arg10[%c1_13, %c4_14], %10 {strides = array<i32>} : memref<18x72xf32, #tpu.memory_space<vmem>>, vector<16x64xf32>,
    %cst_15 = arith.constant 0.000000e+00 : f32
    %12 = vector.broadcast %cst_15 : f32 to vector<16x128xf32>
    %c0_16 = arith.constant 0 : index
    %c0_17 = arith.constant 0 : index
    %13 = vector.load %arg9[%c0_16, %c0_17] : memref<18x72xf32, #tpu.memory_space<vmem>>, vector<16x72xf32>
    %c0_18 = arith.constant 0 : index
    %c0_19 = arith.constant 0 : index
    %c0_20 = arith.constant 0 : index
    %14 = vector.load %arg3[%c0_18, %c0_19, %c0_20] : memref<3x72x128xf32, #tpu.memory_space<vmem>>, vector<1x72x128xf32>
    %15 = vector.shape_cast %14 : vector<1x72x128xf32> to vector<72x128xf32>
    %cst_21 = arith.constant dense<0.000000e+00> : vector<16x128xf32>
    %16 = tpu.matmul %13, %15, %cst_21 {dimension_numbers = #tpu.dot_dimension_numbers<[1], [0], [0], [1], [0, 0, 1, 1], [], []>} : vector<16x72xf32>, vector<72x128xf32>, vector<16x128xf32> -> vector<16x128xf32>
    %17 = arith.addf %12, %16 : vector<16x128xf32>
    %c0_22 = arith.constant 0 : index
    %c0_23 = arith.constant 0 : index
    %18 = vector.load %arg10[%c0_22, %c0_23] : memref<18x72xf32, #tpu.memory_space<vmem>>, vector<16x72xf32>
    %c0_24 = arith.constant 0 : index
    %c0_25 = arith.constant 0 : index
    %c0_26 = arith.constant 0 : index
    %19 = vector.load %arg4[%c0_24, %c0_25, %c0_26] : memref<3x72x128xf32, #tpu.memory_space<vmem>>, vector<1x72x128xf32>
    %20 = vector.shape_cast %19 : vector<1x72x128xf32> to vector<72x128xf32>
    %cst_27 = arith.constant dense<0.000000e+00> : vector<16x128xf32>
    %21 = tpu.matmul %18, %20, %cst_27 {dimension_numbers = #tpu.dot_dimension_numbers<[1], [0], [0], [1], [0, 0, 1, 1], [], []>} : vector<16x72xf32>, vector<72x128xf32>, vector<16x128xf32> -> vector<16x128xf32>
    %22 = arith.addf %17, %21 : vector<16x128xf32>
    %c1_28 = arith.constant 1 : index
    %c0_29 = arith.constant 0 : index
    %23 = vector.load %arg9[%c1_28, %c0_29] : memref<18x72xf32, #tpu.memory_space<vmem>>, vector<16x72xf32>
    %c1_30 = arith.constant 1 : index
    %c0_31 = arith.constant 0 : index
    %c0_32 = arith.constant 0 : index
    %24 = vector.load %arg3[%c1_30, %c0_31, %c0_32] : memref<3x72x128xf32, #tpu.memory_space<vmem>>, vector<1x72x128xf32>
    %25 = vector.shape_cast %24 : vector<1x72x128xf32> to vector<72x128xf32>
    %cst_33 = arith.constant dense<0.000000e+00> : vector<16x128xf32>
    %26 = tpu.matmul %23, %25, %cst_33 {dimension_numbers = #tpu.dot_dimension_numbers<[1], [0], [0], [1], [0, 0, 1, 1], [], []>} : vector<16x72xf32>, vector<72x128xf32>, vector<16x128xf32> -> vector<16x128xf32>
    %27 = arith.addf %22, %26 : vector<16x128xf32>
    %c1_34 = arith.constant 1 : index
    %c0_35 = arith.constant 0 : index
    %28 = vector.load %arg10[%c1_34, %c0_35] : memref<18x72xf32, #tpu.memory_space<vmem>>, vector<16x72xf32>
    %c1_36 = arith.constant 1 : index
    %c0_37 = arith.constant 0 : index
    %c0_38 = arith.constant 0 : index
    %29 = vector.load %arg4[%c1_36, %c0_37, %c0_38] : memref<3x72x128xf32, #tpu.memory_space<vmem>>, vector<1x72x128xf32>
    %30 = vector.shape_cast %29 : vector<1x72x128xf32> to vector<72x128xf32>
    %cst_39 = arith.constant dense<0.000000e+00> : vector<16x128xf32>
    %31 = tpu.matmul %28, %30, %cst_39 {dimension_numbers = #tpu.dot_dimension_numbers<[1], [0], [0], [1], [0, 0, 1, 1], [], []>} : vector<16x72xf32>, vector<72x128xf32>, vector<16x128xf32> -> vector<16x128xf32>
    %32 = arith.addf %27, %31 : vector<16x128xf32>
    %c2 = arith.constant 2 : index
    %c0_40 = arith.constant 0 : index
    %33 = vector.load %arg9[%c2, %c0_40] : memref<18x72xf32, #tpu.memory_space<vmem>>, vector<16x72xf32>
    %c2_41 = arith.constant 2 : index
    %c0_42 = arith.constant 0 : index
    %c0_43 = arith.constant 0 : index
    %34 = vector.load %arg3[%c2_41, %c0_42, %c0_43] : memref<3x72x128xf32, #tpu.memory_space<vmem>>, vector<1x72x128xf32>
    %35 = vector.shape_cast %34 : vector<1x72x128xf32> to vector<72x128xf32>
    %cst_44 = arith.constant dense<0.000000e+00> : vector<16x128xf32>
    %36 = tpu.matmul %33, %35, %cst_44 {dimension_numbers = #tpu.dot_dimension_numbers<[1], [0], [0], [1], [0, 0, 1, 1], [], []>} : vector<16x72xf32>, vector<72x128xf32>, vector<16x128xf32> -> vector<16x128xf32>
    %37 = arith.addf %32, %36 : vector<16x128xf32>
    %c2_45 = arith.constant 2 : index
    %c0_46 = arith.constant 0 : index
    %38 = vector.load %arg10[%c2_45, %c0_46] : memref<18x72xf32, #tpu.memory_space<vmem>>, vector<16x72xf32>
    %c2_47 = arith.constant 2 : index
    %c0_48 = arith.constant 0 : index
    %c0_49 = arith.constant 0 : index
    %39 = vector.load %arg4[%c2_47, %c0_48, %c0_49] : memref<3x72x128xf32, #tpu.memory_space<vmem>>, vector<1x72x128xf32>
    %40 = vector.shape_cast %39 : vector<1x72x128xf32> to vector<72x128xf32>
    %cst_50 = arith.constant dense<0.000000e+00> : vector<16x128xf32>
    %41 = tpu.matmul %38, %40, %cst_50 {dimension_numbers = #tpu.dot_dimension_numbers<[1], [0], [0], [1], [0, 0, 1, 1], [], []>} : vector<16x72xf32>, vector<72x128xf32>, vector<16x128xf32> -> vector<16x128xf32>
    %42 = arith.addf %37, %41 : vector<16x128xf32>
    %c0_51 = arith.constant 0 : index
    %c0_52 = arith.constant 0 : index
    %43 = vector.load %arg5[%c0_51, %c0_52] : memref<1x128xf32, #tpu.memory_space<vmem>>, vector<1x128xf32>
    %44 = vector.broadcast %43 : vector<1x128xf32> to vector<16x128xf32>
    %45 = arith.addf %42, %44 : vector<16x128xf32>
    %cst_53 = arith.constant 0.000000e+00 : f32
    %46 = vector.broadcast %cst_53 : f32 to vector<16x128xf32>
    %47 = arith.maximumf %45, %46 : vector<16x128xf32>
    %c1_54 = arith.constant 1 : index
    %c8 = arith.constant 8 : index
    %48 = vector.load %arg11[%c1_54, %c8] : memref<18x144xf32, #tpu.memory_space<vmem>>, vector<16x128xf32>
    tpu.vector_store %arg11[%c1_54, %c8], %47 {strides = array<i32>} : memref<18x144xf32, #tpu.memory_space<vmem>>, vector<16x128xf32>,
    %cst_55 = arith.constant 0.000000e+00 : f32
    %49 = vector.broadcast %cst_55 : f32 to vector<16x128xf32>
    %c0_56 = arith.constant 0 : index
    %c0_57 = arith.constant 0 : index
    %50 = vector.load %arg11[%c0_56, %c0_57] : memref<18x144xf32, #tpu.memory_space<vmem>>, vector<16x144xf32>
    %c0_58 = arith.constant 0 : index
    %c0_59 = arith.constant 0 : index
    %c0_60 = arith.constant 0 : index
    %51 = vector.load %arg6[%c0_58, %c0_59, %c0_60] : memref<3x144x128xf32, #tpu.memory_space<vmem>>, vector<1x144x128xf32>
    %52 = vector.shape_cast %51 : vector<1x144x128xf32> to vector<144x128xf32>
    %cst_61 = arith.constant dense<0.000000e+00> : vector<16x128xf32>
    %53 = tpu.matmul %50, %52, %cst_61 {dimension_numbers = #tpu.dot_dimension_numbers<[1], [0], [0], [1], [0, 0, 1, 1], [], []>} : vector<16x144xf32>, vector<144x128xf32>, vector<16x128xf32> -> vector<16x128xf32>
    %54 = arith.addf %49, %53 : vector<16x128xf32>
    %c1_62 = arith.constant 1 : index
    %c0_63 = arith.constant 0 : index
    %55 = vector.load %arg11[%c1_62, %c0_63] : memref<18x144xf32, #tpu.memory_space<vmem>>, vector<16x144xf32>
    %c1_64 = arith.constant 1 : index
    %c0_65 = arith.constant 0 : index
    %c0_66 = arith.constant 0 : index
    %56 = vector.load %arg6[%c1_64, %c0_65, %c0_66] : memref<3x144x128xf32, #tpu.memory_space<vmem>>, vector<1x144x128xf32>
    %57 = vector.shape_cast %56 : vector<1x144x128xf32> to vector<144x128xf32>
    %cst_67 = arith.constant dense<0.000000e+00> : vector<16x128xf32>
    %58 = tpu.matmul %55, %57, %cst_67 {dimension_numbers = #tpu.dot_dimension_numbers<[1], [0], [0], [1], [0, 0, 1, 1], [], []>} : vector<16x144xf32>, vector<144x128xf32>, vector<16x128xf32> -> vector<16x128xf32>
    %59 = arith.addf %54, %58 : vector<16x128xf32>
    %c2_68 = arith.constant 2 : index
    %c0_69 = arith.constant 0 : index
    %60 = vector.load %arg11[%c2_68, %c0_69] : memref<18x144xf32, #tpu.memory_space<vmem>>, vector<16x144xf32>
    %c2_70 = arith.constant 2 : index
    %c0_71 = arith.constant 0 : index
    %c0_72 = arith.constant 0 : index
    %61 = vector.load %arg6[%c2_70, %c0_71, %c0_72] : memref<3x144x128xf32, #tpu.memory_space<vmem>>, vector<1x144x128xf32>
    %62 = vector.shape_cast %61 : vector<1x144x128xf32> to vector<144x128xf32>
    %cst_73 = arith.constant dense<0.000000e+00> : vector<16x128xf32>
    %63 = tpu.matmul %60, %62, %cst_73 {dimension_numbers = #tpu.dot_dimension_numbers<[1], [0], [0], [1], [0, 0, 1, 1], [], []>} : vector<16x144xf32>, vector<144x128xf32>, vector<16x128xf32> -> vector<16x128xf32>
    %64 = arith.addf %59, %63 : vector<16x128xf32>
    %c0_74 = arith.constant 0 : index
    %c0_75 = arith.constant 0 : index
    %65 = vector.load %arg7[%c0_74, %c0_75] : memref<1x128xf32, #tpu.memory_space<vmem>>, vector<1x128xf32>
    %66 = vector.broadcast %65 : vector<1x128xf32> to vector<16x128xf32>
    %67 = arith.addf %64, %66 : vector<16x128xf32>
    %cst_76 = arith.constant 0.000000e+00 : f32
    %68 = vector.broadcast %cst_76 : f32 to vector<16x128xf32>
    %69 = arith.maximumf %67, %68 : vector<16x128xf32>
    %c0_77 = arith.constant 0 : index
    %c0_78 = arith.constant 0 : index
    %c0_79 = arith.constant 0 : index
    %70 = vector.load %arg8[%c0_77, %c0_78, %c0_79] : memref<1x16x128xf32, #tpu.memory_space<vmem>>, vector<1x16x128xf32>
    %71 = vector.shape_cast %70 : vector<1x16x128xf32> to vector<16x128xf32>
    %72 = vector.shape_cast %69 : vector<16x128xf32> to vector<1x16x128xf32>
    tpu.vector_store %arg8[%c0_77, %c0_78, %c0_79], %72 {strides = array<i32>} : memref<1x16x128xf32, #tpu.memory_space<vmem>>, vector<1x16x128xf32>,
    return
  }
  func.func @transform_0(%arg0: i32) -> (i32, i32, i32) {
    %c0_i32 = arith.constant 0 : i32
    %c0_i32_0 = arith.constant 0 : i32
    %c0_i32_1 = arith.constant 0 : i32
    return %arg0, %c0_i32, %c0_i32_0 : i32, i32, i32
  }
  func.func @transform_1(%arg0: i32) -> (i32, i32, i32) {
    %c0_i32 = arith.constant 0 : i32
    %c0_i32_0 = arith.constant 0 : i32
    %c0_i32_1 = arith.constant 0 : i32
    return %arg0, %c0_i32, %c0_i32_0 : i32, i32, i32
  }
  func.func @transform_2(%arg0: i32) -> (i32, i32, i32) {
    %c0_i32 = arith.constant 0 : i32
    %c0_i32_0 = arith.constant 0 : i32
    %c0_i32_1 = arith.constant 0 : i32
    %c0_i32_2 = arith.constant 0 : i32
    return %c0_i32, %c0_i32_0, %c0_i32_1 : i32, i32, i32
  }
  func.func @transform_3(%arg0: i32) -> (i32, i32, i32) {
    %c0_i32 = arith.constant 0 : i32
    %c0_i32_0 = arith.constant 0 : i32
    %c0_i32_1 = arith.constant 0 : i32
    %c0_i32_2 = arith.constant 0 : i32
    return %c0_i32, %c0_i32_0, %c0_i32_1 : i32, i32, i32
  }
  func.func @transform_4(%arg0: i32) -> (i32, i32) {
    %c0_i32 = arith.constant 0 : i32
    %c0_i32_0 = arith.constant 0 : i32
    %c0_i32_1 = arith.constant 0 : i32
    return %c0_i32, %c0_i32_0 : i32, i32
  }
  func.func @transform_5(%arg0: i32) -> (i32, i32, i32) {
    %c0_i32 = arith.constant 0 : i32
    %c0_i32_0 = arith.constant 0 : i32
    %c0_i32_1 = arith.constant 0 : i32
    %c0_i32_2 = arith.constant 0 : i32
    return %c0_i32, %c0_i32_0, %c0_i32_1 : i32, i32, i32
  }
  func.func @transform_6(%arg0: i32) -> (i32, i32) {
    %c0_i32 = arith.constant 0 : i32
    %c0_i32_0 = arith.constant 0 : i32
    %c0_i32_1 = arith.constant 0 : i32
    return %c0_i32, %c0_i32_0 : i32, i32
  }
  func.func @transform_7(%arg0: i32) -> (i32, i32, i32) {
    %c0_i32 = arith.constant 0 : i32
    %c0_i32_0 = arith.constant 0 : i32
    %c0_i32_1 = arith.constant 0 : i32
    return %arg0, %c0_i32, %c0_i32_0 : i32, i32, i32
  }
}

</mosaic_0001>

<bundles_post_ra>
// kernel: tpu_custom_call.1
= control target key start
LH: loop header
LB: loop body
LE: loop exit
PB: predicated region body
PF: predicated region fallthrough
CT: control target
= control target key end

     0   :  { %s2500_s0 = inlined_call_operand.hbm [shape: f32[2,16,64], index: 0, kind: input, shape index: {}]   ;;  %s2501_s1 = inlined_call_operand.hbm [shape: f32[2,16,64], index: 1, kind: input, shape index: {}]   ;;  %s2502_s2 = inlined_call_operand.hbm [shape: f32[3,72,128], index: 2, kind: input, shape index: {}]   ;;  %s2503_s3 = inlined_call_operand.hbm [shape: f32[3,72,128], index: 3, kind: input, shape index: {}]   ;;  %s2504_s4 = inlined_call_operand.vmem [shape: f32[1,128], index: 4, kind: input, shape index: {}]   ;;  %s2505_s5 = inlined_call_operand.hbm [shape: f32[3,144,128], index: 5, kind: input, shape index: {}]   ;;  %s2506_s6 = inlined_call_operand.vmem [shape: f32[1,128], index: 6, kind: input, shape index: {}]   ;;  %s2507_s7 = inlined_call_operand.hbm [shape: f32[2,16,128], index: 7, kind: output, shape index: {}]  }
   0x1   :  { %2516 = sst [smem:[#allocation22_spill]] %s2500_s0 }
   0x2   :  { %2517 = sst [smem:[#allocation23_spill]] %s2502_s2 }
   0x3   :  { %2518 = sst [smem:[#allocation24_spill]] %s2503_s3 }
   0x4   :  { %2519 = sst [smem:[#allocation25_spill]] %s2505_s5 }
   0x5   :  { %12 = vsyncpa [#allocation6], 0 }
   0x6   :  { %14 = vsyncpa [#allocation6 + $0x1], 0 }
   0x7   :  { %15 = vsyncpa [#allocation9], 0 }
   0x8   :  { %17 = vsyncpa [#allocation9 + $0x1], 0 }
   0x9   :  { %18 = vsyncpa [#allocation12], 0 }
   0xa   :  { %19 = vsyncpa [#allocation7], 0 }
   0xb   :  { %21 = vsyncpa [#allocation7 + $0x1], 0  ;;  %s2109_s24 = smov 0   ;;  %s2111_s25 = smov 0  }
   0xc   :  { %s2113_s26 = smov 0   ;;  %s2115_s27 = smov 0  }
   0xd LB: > { %2520 = sst [smem:[#allocation20_spill]] %s2051_s26  ;;  %s2130_s28 = sadd.s32 4294967295, %s2055_s27   ;;  %s2055_s27 = sphi %s2115_s27, %s2546_s27   ;;  %s2051_s26 = sphi %s2113_s26, %s2543_s26   ;;  %s2047_s25 = sphi %s2111_s25, %s2545_s25   ;;  %s2043_s24 = sphi %s2109_s24, %s2544_s24  }
   0xe   : > { %s1518_s29 = sadd.s32 4294967294, %s2055_s27   ;;  %p47_p0 = scmp.ne.s32.totalorder %s2047_s25, %s2043_s24 }
   0xf   : > { %p2508_p1 = scmp.eq.s32.totalorder %s2130_s28, 0  ;;  %p202_p2 = scmp.eq.s32.totalorder %s2130_s28, 1 }
  0x10   : > { %p208_p3 = scmp.eq.s32.totalorder %s1518_s29, 1  ;;  %p1519_p5 = scmp.ge.s32.totalorder %s2055_s27, 1 }
  0x11   : > { %p2139_p4 = por %p2508_p1, %p47_p0  ;;  %p215_p7 = scmp.lt.s32.totalorder %s2055_s27, 3 }
  0x12   : > { %p2144_p6 = por %p208_p3, %p47_p0  ;;  %s2057_s10 = smov [#allocation10]  }
  0x13   : > { %s2521_s30 = scalar_select %p2139_p4, 1, 0 }
  0x14   : > { %s2522_s8 = scalar_select %p2144_p6, 1, 0 }
  0x15   : > { %p2149_p8 = pnand %p1519_p5, %p215_p7  ;;  %s227_s11 = sshll.u32 %s2057_s10, 4  ;;  %s228_s11 = int_to_ptr.vmem [resolvable:$true] %s227_s11 }
  0x16   : > { %s2058_s13 = smov [#allocation11]   ;;  %s2059_s15 = smov [#allocation13]  }
  0x17   : > { %p1775_p9 = pneg %p2149_p8  ;;  %s240_s14 = sshll.u32 %s2058_s13, 4  ;;  %s241_s14 = int_to_ptr.vmem [resolvable:$true] %s240_s14 }
  0x18   : > { %s256_s16 = sshll.u32 %s2059_s15, 4  ;;  %s1856_s17 = scalar_lea.vmem %s228_s11, 3456  ;;  %s257_s16 = int_to_ptr.vmem [resolvable:$true] %s256_s16 }
  0x19   : > { %p2158_p11 = pnand %p1775_p9, %p2508_p1  ;;  %p1857_p13 = scmp.ne.s32.totalorder %s228_s11, %s1856_s17 }
  0x1a   : > { %p1864_p5 = scmp.lt.s32.totalorder %s228_s11, %s228_s11  ;;  %p1865_p7 = scmp.lt.s32.totalorder %s1856_s17, %s1856_s17 }
  0x1b   : > { %p1847_p12 = pneg %p2158_p11 }
  0x1c   : > { %p1866_p9 = por %p1865_p7, %p1864_p5 }
  0x1d   : > { %p1859_p0 = pnand %p1857_p13, %p1847_p12 }
  0x1f   : > { %p1860_p3 = pneg %p1859_p0 }
  0x21   : > { %p1867_p10 = pnand %p1866_p9, %p1860_p3 }
  0x23   : > { %1870 = shalt.err (!%p1867_p10)
}
  0x24   : > { %s2509_s18 = smov 128   ;;  %s2511_s19 = smov 8  }
  0x25   : > { %s2525_s2 = sld [smem:[#allocation23_spill]]  ;;  %s1882_s22 = scalar_lea.vmem %s241_s14, 3456 }
  0x26   : > { %p1883_p13 = scmp.ne.s32.totalorder %s241_s14, %s1882_s22  ;;  %p1890_p3 = scmp.lt.s32.totalorder %s241_s14, %s241_s14 }
  0x27   : > { %p1891_p10 = scmp.lt.s32.totalorder %s1882_s22, %s1882_s22 }
  0x28   : > { %p1885_p0 = pnand %p1883_p13, %p1847_p12 }
  0x29   : > { %p1892_p7 = por %p1891_p10, %p1890_p3 }
  0x2a   : > { %p1886_p5 = pneg %p1885_p0 }
  0x2b   : > { %1778 = dma.hbm_to_vmem [thread:$0]  (!%p2158_p11), %s2525_s2, 3456, %s228_s11, [#allocation9], %s2509_s18, %s2509_s18, %s2511_s19  }
  0x2c   : > { %p1893_p9 = pnand %p1892_p7, %p1886_p5 }
  0x2e   : > { %1896 = shalt.err (!%p1893_p9)
}
  0x2f   : > { %s2526_s3 = sld [smem:[#allocation24_spill]]  ;;  %s1908_s10 = scalar_lea.vmem %s257_s16, 6912 }
  0x30   : > { %p1909_p1 = scmp.ne.s32.totalorder %s257_s16, %s1908_s10  ;;  %p1916_p3 = scmp.lt.s32.totalorder %s257_s16, %s257_s16 }
  0x31   : > { %p1917_p5 = scmp.lt.s32.totalorder %s1908_s10, %s1908_s10 }
  0x32   : > { %p1911_p13 = pnand %p1909_p1, %p1847_p12 }
  0x33   : > { %p1918_p10 = por %p1917_p5, %p1916_p3 }
  0x34   : > { %p1912_p0 = pneg %p1911_p13 }
  0x35   : > { %1781 = dma.hbm_to_vmem [thread:$0]  (!%p2158_p11), %s2526_s3, 3456, %s241_s14, [#allocation12], %s2509_s18, %s2509_s18, %s2511_s19  }
  0x36   : > { %p1919_p7 = pnand %p1918_p10, %p1912_p0 }
  0x38   : > { %1922 = shalt.err (!%p1919_p7)
}
  0x39   : > { %s2527_s5 = sld [smem:[#allocation25_spill]]  ;;  %s2198_s14 = sadd.s32 1, %s2055_s27  }
  0x3a   : > { %s31_s12 = ssub.s32 %s2055_s27, %s2198_s14  ;;  %s34_s15 = sadd.s32 1, %s2051_s26 }
  0x3b   : > { %p32_p1 = scmp.eq.s32.totalorder %s31_s12, 0  ;;  %p41_p12 = scmp.ne.s32.totalorder %s2051_s26, %s2047_s25 }
  0x3c   : > { %p42_p9 = scmp.eq.s32.totalorder %s2055_s27, 0  ;;  %p1799_p13 = scmp.lt.s32.totalorder %s2055_s27, 2 }
  0x3d   : > { %s2208_s17 = scalar_select %p32_p1, %s2051_s26, %s34_s15  }
  0x3e   : > { %p43_p0 = por %p42_p9, %p41_p12  ;;  %p2212_p3 = por %p202_p2, %p41_p12 }
  0x3f   : > { %1784 = dma.hbm_to_vmem [thread:$0]  (!%p2158_p11), %s2527_s5, 6912, %s257_s16, [#allocation12], %s2509_s18, %s2509_s18, %s2511_s19  }
  0x40   : > { %2528 = sst [smem:[#allocation21_spill]] %s2208_s17  ;;  %s273_s21 = sand.u32 1, %s2051_s26  }
  0x41   : > { %s2529_s20 = scalar_select %p2212_p3, 1, 0 }
  0x42   : > { %s1562_s22 = sshll.u32 %s2055_s27, 8  ;;  %s2218_s16 = sshll.u32 %s273_s21, 4 }
  0x43   : > { %s2530_s0 = sld [smem:[#allocation22_spill]]  ;;  %s277_s11 = scalar_lea.vmem [#allocation5], %s2218_s16 }
  0x44   : > { %s284_s13 = sshll.u32 %s277_s11, 4  ;;  %p2226_p11 = pnand %p1799_p13, %p43_p0  ;;  %s2230_s13 = int_to_ptr.vmem [resolvable:$true] %s284_s13 }
  0x45   : > { %s2235_s23 = scalar_lea.hbm %s2501_s1, %s1562_s22  ;;  %s2237_s29 = scalar_lea.sflag [#allocation6], %s273_s21 }
  0x46   : > { %p1925_p5 = pneg %p2226_p11 }
  0x49   : > { %s2223_s10 = scalar_lea.hbm %s2530_s0, %s1562_s22  ;;  %s1928_s3 = scalar_lea.hbm %s2530_s0, 512 }
  0x4a   : > { %s1923_s19 = scalar_lea.hbm %s2223_s10, 256  ;;  %p1929_p1 = scmp.lt.s32.totalorder %s2223_s10, %s2530_s0 }
  0x4b   : > { %p1924_p2 = scmp.ne.s32.totalorder %s2223_s10, %s1923_s19  ;;  %p1930_p12 = scmp.lt.s32.totalorder %s1928_s3, %s1923_s19 }
  0x4d   : > { %p1926_p10 = pnand %p1925_p5, %p1924_p2  ;;  %p1931_p9 = por %p1930_p12, %p1929_p1 }
  0x4f   : > { %p1927_p7 = pneg %p1926_p10 }
  0x51   : > { %p1932_p13 = pnand %p1931_p9, %p1927_p7 }
  0x53   : > { %1935 = shalt.err (!%p1932_p13)
}
  0x54   : > { %s1936_s18 = scalar_lea.vmem %s2230_s13, 256  ;;  %s2062_s2 = smov [#allocation5]  }
  0x55   : > { %p1937_p0 = scmp.ne.s32.totalorder %s2230_s13, %s1936_s18  ;;  %s1941_s21 = sshll.u32 %s2062_s2, 4  ;;  %s1942_s21 = int_to_ptr.vmem [resolvable:$false] %s1941_s21 }
  0x56   : > { %s1943_s22 = scalar_lea.vmem %s1942_s21, 512  ;;  %p1944_p6 = scmp.lt.s32.totalorder %s2230_s13, %s1942_s21 }
  0x57   : > { %p1939_p2 = pnand %p1937_p0, %p1925_p5  ;;  %p1945_p3 = scmp.lt.s32.totalorder %s1943_s22, %s1936_s18 }
  0x59   : > { %p1940_p10 = pneg %p1939_p2  ;;  %p1946_p4 = por %p1945_p3, %p1944_p6 }
  0x5b   : > { %p1947_p1 = pnand %p1946_p4, %p1940_p10 }
  0x5d   : > { %1950 = shalt.err (!%p1947_p1)
}
  0x5e   : > { %s2532_s3 = smov 8   ;;  %s2533_s5 = smov 128  }
  0x5f   : > { %1788 = dma.hbm_to_vmem [thread:$0]  (!%p2226_p11), %s2223_s10, 256, %s2230_s13, %s2237_s29, %s2533_s5, %s2533_s5, %s2532_s3  }
  0x60   : > { %s298_s19 = scalar_lea.vmem [#allocation8], %s2218_s16  ;;  %s294_s15 = sand.u32 1, %s2055_s27  }
  0x61   : > { %s305_s17 = sshll.u32 %s298_s19, 4  ;;  %s295_s11 = scalar_lea.sflag [#allocation9], %s294_s15  ;;  %s2269_s17 = int_to_ptr.vmem [resolvable:$true] %s305_s17 }
  0x62   : > { %s1951_s18 = scalar_lea.hbm %s2235_s23, 256  ;;  %s1956_s22 = scalar_lea.hbm %s2501_s1, 512 }
  0x63   : > { %p1952_p4 = scmp.ne.s32.totalorder %s2235_s23, %s1951_s18  ;;  %p1957_p7 = scmp.lt.s32.totalorder %s2235_s23, %s2501_s1 }
  0x64   : > { %p1958_p12 = scmp.lt.s32.totalorder %s1956_s22, %s1951_s18 }
  0x65   : > { %p1954_p6 = pnand %p1952_p4, %p1925_p5 }
  0x66   : > { %p1959_p9 = por %p1958_p12, %p1957_p7 }
  0x67   : > { %p1955_p3 = pneg %p1954_p6 }
  0x69   : > { %p1960_p13 = pnand %p1959_p9, %p1955_p3 }
  0x6b   : > { %1963 = shalt.err (!%p1960_p13)
}
  0x6c   : > { %s1964_s16 = scalar_lea.vmem %s2269_s17, 256  ;;  %s2063_s10 = smov [#allocation8]  }
  0x6d   : > { %p1965_p0 = scmp.ne.s32.totalorder %s2269_s17, %s1964_s16  ;;  %s1969_s13 = sshll.u32 %s2063_s10, 4  ;;  %s1970_s13 = int_to_ptr.vmem [resolvable:$false] %s1969_s13 }
  0x6e   : > { %s1971_s29 = scalar_lea.vmem %s1970_s13, 512  ;;  %p1972_p1 = scmp.lt.s32.totalorder %s2269_s17, %s1970_s13 }
  0x6f   : > { %p1967_p2 = pnand %p1965_p0, %p1925_p5  ;;  %p1973_p4 = scmp.lt.s32.totalorder %s1971_s29, %s1964_s16 }
  0x71   : > { %p1968_p10 = pneg %p1967_p2  ;;  %p1974_p6 = por %p1973_p4, %p1972_p1 }
  0x73   : > { %p1975_p7 = pnand %p1974_p6, %p1968_p10 }
  0x75   : > { %1978 = shalt.err (!%p1975_p7)
}
  0x76   : > { %1791 = dma.hbm_to_vmem [thread:$0]  (!%p2226_p11), %s2235_s23, 256, %s2269_s17, %s295_s11, %s2533_s5, %s2533_s5, %s2532_s3  }
  0x77   : > { %317 = sbr.rel (%p2149_p8) target bundleno = 904 (0x388), region = 48  ;;  %s2299_s0 = sand.u32 (!%p2149_p8), 1, %s2047_s25  }
  0x78   : > { %s2302_s26 = sshll.u32 (!%p2149_p8), %s2299_s0, 4  ;;  %s320_s19 = scalar_lea.sflag (!%p2149_p8), [#allocation6], %s2299_s0 }
  0x79   : > { %s323_s12 = scalar_lea.vmem (!%p2149_p8), [#allocation5], %s2302_s26  ;;  %p2534_p5 = scmp.ne.s32.totalorder (!%p2149_p8), %s2521_s30, 0 }
  0x7c   : > { %2022 = dma.done.wait (%p2534_p5), %s320_s19, 256  }
  0x7d   : > { %2024 = vsyncadd (%p2534_p5), %s320_s19, 4294967040  ;;  %s328_s9 = sand.u32 1, %s2130_s28   ;;  %s332_s3 = scalar_lea.vmem [#allocation8], %s2302_s26 }
  0x7e   : > { %s329_s23 = scalar_lea.sflag [#allocation9], %s328_s9 }
  0x7f   : > { %2026 = dma.done.wait (%p2534_p5), %s329_s23, 256  }
  0x80   : > { %2028 = vsyncadd (%p2534_p5), %s329_s23, 4294967040  ;;  %p2535_p8 = scmp.eq.s32.totalorder %s2130_s28, 0 }
  0x82   : > { %2030 = dma.done.wait (%p2535_p8), [#allocation9], 3456   ;;  %p2536_p11 = pmov %p2535_p8 }
  0x83   : > { %p2537_p3 = pmov %p2535_p8 }
  0x84   : > { %2032 = vsyncadd (%p2536_p11), [#allocation9], 4294963840 }
  0x85   : > { %2034 = dma.done.wait (%p2537_p3), [#allocation12], 10368   ;;  %p2538_p12 = pmov %p2537_p3 }
  0x86   : > { %vm380_vm0 = vcmask 588800   ;;  %v2064_v0 = vmov 0.0   ;;  %vm383_vm1 = vcmask 582656   ;;  %v409_v1 = vld [vmem:[%s332_s3] sm:$0xff]  ;;  %s2065_s30 = smov 4   ;;  %v410_v3 = vld [vmem:[%s332_s3 + $0x8] sm:$0xff] }
  0x87   : > { %2036 = vsyncadd (%p2538_p12), [#allocation12], 4294956928  ;;  %385 = vst.msk [vmem:[#allocation3] sm:$0xff] %vm380_vm0, %v2064_v0  ;;  %v396_v2 = vld [vmem:[%s323_s12] sm:$0xff]  ;;  %413 = vrot.lane.b32.xlu0 %v409_v1, %s2065_s30  ;;  %v442_v4 = vld [vmem:[#allocation11 + $0x40] sm:$0xff]  ;;  %vm406_vm2 = vcmask 556064  }
  0x88   : > { %386 = vst.msk [vmem:[#allocation3 + $0x8] sm:$0xff] %vm380_vm0, %v2064_v0  ;;  %381 = vst.msk [vmem:[#allocation2] sm:$0xff] %vm380_vm0, %v2064_v0  ;;  %400 = vrot.lane.b32.xlu1 %v396_v2, %s2065_s30  ;;  %v616_v5 = vld [vmem:[#allocation10 + $0x88] sm:$0xff]  ;;  %1631 = vmatprep.subr.mxu1 %v442_v4  ;;  %v441_v7 = vld [vmem:[#allocation11 + $0x38] sm:$0xff]  ;;  %vm389_vm3 = vcmask 130048   ;;  %vm394_vm4 = vcmask 123904  }
  0x89   : > { %382 = vst.msk [vmem:[#allocation2 + $0x8] sm:$0xff] %vm380_vm0, %v2064_v0  ;;  %388 = vst [vmem:[#allocation4] sm:$0xff] %v2064_v0  ;;  %v397_v6 = vld [vmem:[%s323_s12 + $0x8] sm:$0xff]  ;;  %1673 = vmatprep.subr.mxu0 %v616_v5  ;;  %v615_v8 = vld [vmem:[#allocation10 + $0x80] sm:$0xff]  ;;  %1632 = vmatpush3.msra.mxu1 %v442_v4  ;;  %vm998_vm5 = vcmask 1040384   ;;  %s2066_s15 = smov 8  }
  0x8a   : > { %391 = vst [vmem:[#allocation4 + $0x10] sm:$0xff] %v2064_v0  ;;  %393 = vst [vmem:[#allocation4 + $0x20] sm:$0x3] %v2064_v0  ;;  %1674 = vmatpush3.msra.mxu0 %v616_v5  ;;  %1633 = vmatprep.subr.mxu1 %v441_v7  ;;  %v440_v9 = vld [vmem:[#allocation11 + $0x30] sm:$0xff]  ;;  %v614_v10 = vld [vmem:[#allocation10 + $0x78] sm:$0xff]  ;;  %vm1011_vm6 = vcmask 1047617  }
  0x8b   : > { %387 = vst.msk [vmem:[#allocation3 + $0x10] sm:$0x3] %vm383_vm1, %v2064_v0  ;;  %384 = vst.msk [vmem:[#allocation2 + $0x10] sm:$0x3] %vm383_vm1, %v2064_v0  ;;  %1675 = vmatprep.subr.mxu0 %v615_v8  ;;  %415 = vrot.lane.b32.xlu0 %v410_v3, %s2065_s30  ;;  %v439_v11 = vld [vmem:[#allocation11 + $0x28] sm:$0xff]  ;;  %v613_v12 = vld [vmem:[#allocation10 + $0x70] sm:$0xff] }
  0x8c   : > { %402 = vrot.lane.b32.xlu1 %v397_v6, %s2065_s30  ;;  %1634 = vmatpush3.msra.mxu1 %v441_v7  ;;  %v438_v13 = vld [vmem:[#allocation11 + $0x20] sm:$0xff]  ;;  %v612_v14 = vld [vmem:[#allocation10 + $0x68] sm:$0xff]  ;;  %v437_v15 = vld [vmem:[#allocation11 + $0x18] sm:$0xff]  ;;  %390 = vst.msk [vmem:[#allocation4 + $0x8] sm:$0xff] %vm389_vm3, %v2064_v0  ;;  %vm1013_vm7 = vcmask 64513   ;;  %vm1015_vm8 = vcmask 1047616  }
  0x8d   : > { %1676 = vmatpush3.msra.mxu0 %v615_v8  ;;  %1635 = vmatprep.subr.mxu1 %v440_v9  ;;  %v611_v16 = vld [vmem:[#allocation10 + $0x60] sm:$0xff]  ;;  %v436_v17 = vld [vmem:[#allocation11 + $0x10] sm:$0xff]  ;;  %v610_v18 = vld [vmem:[#allocation10 + $0x58] sm:$0xff]  ;;  %392 = vst.msk [vmem:[#allocation4 + $0x18] sm:$0xff] %vm389_vm3, %v2064_v0  ;;  %vm1017_vm9 = vcmask 64512   ;;  %vm1019_vm10 = vcmask 1040448  }
  0x8e   : > { %1677 = vmatprep.subr.mxu0 %v614_v10  ;;  %1636 = vmatpush3.msra.mxu1 %v440_v9  ;;  %v435_v19 = vld [vmem:[#allocation11 + $0x8] sm:$0xff]  ;;  %v609_v20 = vld [vmem:[#allocation10 + $0x50] sm:$0xff]  ;;  %v434_v21 = vld [vmem:[#allocation11] sm:$0xff]  ;;  %395 = vst.msk [vmem:[#allocation4 + $0x28] sm:$0x3] %vm394_vm4, %v2064_v0  ;;  %vm1021_vm11 = vcmask 57344  }
  0x8f   : > { %1678 = vmatpush3.msra.mxu0 %v614_v10  ;;  %1637 = vmatprep.subr.mxu1 %v439_v11  ;;  %v608_v22 = vld [vmem:[#allocation10 + $0x48] sm:$0xff]  ;;  %v431_v23 = vld [vmem:[#allocation10 + $0x40] sm:$0xff]  ;;  %v806_v24 = vld [vmem:[#allocation10 + $0xd0] sm:$0xff]  ;;  %vm1074_vm12 = vcmask 1046528   ;;  %vm1273_vm13 = vcmask 1045504   ;;  %s379_s2 = scalar_lea.vmem [#allocation14], %s2302_s26 }
  0x90   : > { %1679 = vmatprep.subr.mxu0 %v613_v12  ;;  %1638 = vmatpush3.msra.mxu1 %v439_v11  ;;  %v430_v31 = vld [vmem:[#allocation10 + $0x38] sm:$0xff]  ;;  %v805_v34 = vld [vmem:[#allocation10 + $0xc8] sm:$0xff]  ;;  %v429_v35 = vld [vmem:[#allocation10 + $0x30] sm:$0xff]  ;;  %s1394_s21 = sshll.u32 %s379_s2, 4  ;;  %s1564_s22 = sshll.u32 %s2130_s28, 8  ;;  %s2451_s21 = int_to_ptr.vmem [resolvable:$true] %s1394_s21 }
  0x91   : > { %1680 = vmatpush3.msra.mxu0 %v613_v12  ;;  %1639 = vmatprep.subr.mxu1 %v438_v13  ;;  %v804_v36 = vld [vmem:[#allocation10 + $0xc0] sm:$0xff]  ;;  %v428_v37 = vld [vmem:[#allocation10 + $0x28] sm:$0xff]  ;;  %v803_v38 = vld [vmem:[#allocation10 + $0xb8] sm:$0xff]  ;;  %s2456_s13 = scalar_lea.hbm %s2507_s7, %s1564_s22  ;;  %s1381_s29 = scalar_lea.sflag [#allocation7], %s2299_s0 }
  0x92   : > { %1681 = vmatprep.subr.mxu0 %v612_v14  ;;  %1640 = vmatpush3.msra.mxu1 %v438_v13  ;;  %v427_v39 = vld [vmem:[#allocation10 + $0x20] sm:$0xff]  ;;  %v802_v40 = vld [vmem:[#allocation10 + $0xb0] sm:$0xff]  ;;  %v426_v41 = vld [vmem:[#allocation10 + $0x18] sm:$0xff]  ;;  %s1979_s26 = scalar_lea.vmem %s2451_s21, 256  ;;  %p2539_p13 = scmp.ne.s32.totalorder %s2529_s20, 0 }
  0x93   : > { %1682 = vmatpush3.msra.mxu0 %v612_v14  ;;  %1641 = vmatprep.subr.mxu1 %v437_v15  ;;  %v801_v42 = vld [vmem:[#allocation10 + $0xa8] sm:$0xff]  ;;  %v425_v43 = vld [vmem:[#allocation10 + $0x10] sm:$0xff]  ;;  %v800_v44 = vld [vmem:[#allocation10 + $0xa0] sm:$0xff]  ;;  %p1980_p9 = scmp.ne.s32.totalorder %s2451_s21, %s1979_s26  ;;  %s2067_s28 = smov [#allocation14]  }
  0x94   : > { %1683 = vmatprep.subr.mxu0 %v611_v16  ;;  %1642 = vmatpush3.msra.mxu1 %v437_v15  ;;  %v424_v45 = vld [vmem:[#allocation10 + $0x8] sm:$0xff]  ;;  %v799_v46 = vld [vmem:[#allocation10 + $0x98] sm:$0xff]  ;;  %v423_v49 = vld [vmem:[#allocation10] sm:$0xff]  ;;  %s1983_s19 = sshll.u32 %s2067_s28, 4  ;;  %s1984_s19 = int_to_ptr.vmem [resolvable:$false] %s1983_s19 }
  0x95   : > { %1684 = vmatpush3.msra.mxu0 %v611_v16  ;;  %1643 = vmatprep.subr.mxu1 %v436_v17  ;;  %v798_v50 = vld [vmem:[#allocation10 + $0x90] sm:$0xff]  ;;  %v711_v51 = vld [vmem:[#allocation11 + $0x88] sm:$0xff]  ;;  %v710_v54 = vld [vmem:[#allocation11 + $0x80] sm:$0xff]  ;;  %p1981_p0 = pnand %p1980_p9, %p2539_p13  ;;  %s1985_s12 = scalar_lea.vmem %s1984_s19, 512 }
  0x96   : > { %1685 = vmatprep.subr.mxu0 %v610_v18  ;;  %1644 = vmatpush3.msra.mxu1 %v436_v17  ;;  %v709_v56 = vld [vmem:[#allocation11 + $0x78] sm:$0xff]  ;;  %v708_v57 = vld [vmem:[#allocation11 + $0x70] sm:$0xff]  ;;  %v707_v58 = vld [vmem:[#allocation11 + $0x68] sm:$0xff]  ;;  %p1986_p10 = scmp.lt.s32.totalorder %s2451_s21, %s1984_s19  ;;  %p1987_p1 = scmp.lt.s32.totalorder %s1985_s12, %s1979_s26 }
  0x97   : > { %1686 = vmatpush3.msra.mxu0 %v610_v18  ;;  %1645 = vmatprep.subr.mxu1 %v435_v19  ;;  %v706_v59 = vld [vmem:[#allocation11 + $0x60] sm:$0xff]  ;;  %v705_v60 = vld [vmem:[#allocation11 + $0x58] sm:$0xff]  ;;  %v704_v61 = vld [vmem:[#allocation11 + $0x50] sm:$0xff]  ;;  %p1982_p2 = pneg %p1981_p0 }
  0x98   : > { %1687 = vmatprep.subr.mxu0 %v609_v20  ;;  %1646 = vmatpush3.msra.mxu1 %v435_v19  ;;  %v703_v62 = vld [vmem:[#allocation11 + $0x48] sm:$0xff]  ;;  %v901_v63 = vld [vmem:[#allocation11 + $0xd0] sm:$0xff]  ;;  %v899_v4 = vld [vmem:[#allocation11 + $0xc0] sm:$0xff]  ;;  %p1988_p4 = por %p1987_p1, %p1986_p10 }
  0x99   : > { %1688 = vmatpush3.msra.mxu0 %v609_v20  ;;  %1647 = vmatprep.subr.mxu1 %v434_v21  ;;  %v900_v2 = vld [vmem:[#allocation11 + $0xc8] sm:$0xff]  ;;  %v898_v5 = vld [vmem:[#allocation11 + $0xb8] sm:$0xff]  ;;  %v897_v6 = vld [vmem:[#allocation11 + $0xb0] sm:$0xff] }
  0x9a   : > { %1689 = vmatprep.subr.mxu0 %v608_v22  ;;  %1648 = vmatpush3.msra.mxu1 %v434_v21  ;;  %v896_v7 = vld [vmem:[#allocation11 + $0xa8] sm:$0xff]  ;;  %v895_v8 = vld [vmem:[#allocation11 + $0xa0] sm:$0xff]  ;;  %v894_v9 = vld [vmem:[#allocation11 + $0x98] sm:$0xff]  ;;  %p1989_p6 = pnand %p1988_p4, %p1982_p2 }
  0x9b   : > { %1690 = vmatpush3.msra.mxu0 %v608_v22  ;;  %1652 = vmatprep.subr.mxu1 %v431_v23  ;;  %v893_v10 = vld [vmem:[#allocation11 + $0x90] sm:$0xff]  ;;  %v1041_v13 = vld [vmem:[#allocation13 + $0x70] sm:$0xff]  ;;  %v1065_v14 = vld [vmem:[#allocation13 + $0x108] sm:$0xff] }
  0x9c   : > { %1715 = vmatprep.subr.mxu0 %v806_v24  ;;  %v1042_v12 = vld [vmem:[#allocation13 + $0x78] sm:$0xff]  ;;  %v1064_v15 = vld [vmem:[#allocation13 + $0x100] sm:$0xff]  ;;  %v1040_v16 = vld [vmem:[#allocation13 + $0x68] sm:$0xff] }
  0x9d   : > { %v1063_v17 = vld [vmem:[#allocation13 + $0xf8] sm:$0xff]  ;;  %v1039_v18 = vld [vmem:[#allocation13 + $0x60] sm:$0xff]  ;;  %v1062_v19 = vld [vmem:[#allocation13 + $0xf0] sm:$0xff] }
  0x9e   : > { %v1038_v20 = vld [vmem:[#allocation13 + $0x58] sm:$0xff]  ;;  %v1061_v21 = vld [vmem:[#allocation13 + $0xe8] sm:$0xff]  ;;  %v1037_v22 = vld [vmem:[#allocation13 + $0x50] sm:$0xff] }
  0xf9   : > { %v414_v25 = vpop.permute.xlu0 %413 }
  0xfa   : > { %v401_v26 = vpop.permute.xlu1 %400  ;;  %419 = vst.msk [vmem:[#allocation3 + $0x1] sm:$0xff] %vm406_vm2, %v414_v25  ;;  %v1059_v25 = vld [vmem:[#allocation13 + $0xd8] sm:$0xff] }
  0xfb   : > { %407 = vst.msk [vmem:[#allocation2 + $0x1] sm:$0xff] %vm406_vm2, %v401_v26  ;;  %v1035_v26 = vld [vmem:[#allocation13 + $0x40] sm:$0xff] }
  0xfd   : > { %v416_v27 = vpop.permute.xlu0 %415 }
  0xfe   : > { %v403_v28 = vpop.permute.xlu1 %402  ;;  %420 = vst.msk [vmem:[#allocation3 + $0x9] sm:$0xff] %vm406_vm2, %v416_v27  ;;  %v1058_v27 = vld [vmem:[#allocation13 + $0xd0] sm:$0xff] }
  0xff   : > { %408 = vst.msk [vmem:[#allocation2 + $0x9] sm:$0xff] %vm406_vm2, %v403_v28  ;;  %v1034_v28 = vld [vmem:[#allocation13 + $0x38] sm:$0xff] }
 0x101   : > { %v432_v29 = vld [vmem:[#allocation3] sm:$0xff] }
 0x102   : > { %v605_v30 = vld [vmem:[#allocation2 + $0x1] sm:$0xff]  ;;  %1649 = vmatprep.mubr.msk.f32.mxu1 %vm380_vm0, %v432_v29  ;;  %v700_v55 = vld [vmem:[#allocation3 + $0x1] sm:$0xff] }
 0x103   : > { %1691 = vmatprep.mubr.msk.f32.mxu0 %vm380_vm0, %v605_v30  ;;  %v421_v47 = vld [vmem:[#allocation2] sm:$0xff]  ;;  %v1057_v29 = vld [vmem:[#allocation13 + $0xc8] sm:$0xff] }
 0x104   : > { %v1033_v30 = vld [vmem:[#allocation13 + $0x30] sm:$0xff] }
 0x105   : > { %v433_v32 = vld [vmem:[#allocation3 + $0x8] sm:$0xff] }
 0x106   : > { %v606_v33 = vld [vmem:[#allocation2 + $0x9] sm:$0xff]  ;;  %1650 = vmatmul.mubr.msk.f32.vlgmr.msra.gmra.mxu1 %vm380_vm0, %v433_v32  ;;  %v701_v1 = vld [vmem:[#allocation3 + $0x9] sm:$0xff]  ;;  %v1032_v32 = vld [vmem:[#allocation13 + $0x28] sm:$0xff] }
 0x107   : > { %1692 = vmatmul.mubr.msk.f32.vlgmr.msra.gmra.mxu0 %vm380_vm0, %v606_v33  ;;  %1653 = vmatpush3.msra.mxu1 %v431_v23  ;;  %v795_v48 = vld [vmem:[#allocation2 + $0x2] sm:$0xff]  ;;  %v796_v52 = vld [vmem:[#allocation2 + $0xa] sm:$0xff]  ;;  %v890_v3 = vld [vmem:[#allocation3 + $0x2] sm:$0xff] }
 0x108   : > { %1716 = vmatpush3.msra.mxu0 %v806_v24  ;;  %1654 = vmatprep.subr.mxu1 %v430_v31  ;;  %v422_v53 = vld [vmem:[#allocation2 + $0x8] sm:$0xff]  ;;  %v1060_v23 = vld [vmem:[#allocation13 + $0xe0] sm:$0xff]  ;;  %v1036_v24 = vld [vmem:[#allocation13 + $0x48] sm:$0xff] }
 0x109   : > { %1717 = vmatprep.subr.mxu0 %v805_v34  ;;  %1655 = vmatpush3.msra.mxu1 %v430_v31  ;;  %v891_v11 = vld [vmem:[#allocation3 + $0xa] sm:$0xff]  ;;  %v1056_v31 = vld [vmem:[#allocation13 + $0xc0] sm:$0xff] }
 0x10a   : > { %1718 = vmatpush3.msra.mxu0 %v805_v34  ;;  %1656 = vmatprep.subr.mxu1 %v429_v35  ;;  %v1055_v33 = vld [vmem:[#allocation13 + $0xb8] sm:$0xff]  ;;  %v1031_v34 = vld [vmem:[#allocation13 + $0x20] sm:$0xff] }
 0x10b   : > { %1719 = vmatprep.subr.mxu0 %v804_v36  ;;  %1657 = vmatpush3.msra.mxu1 %v429_v35  ;;  %v1054_v35 = vld [vmem:[#allocation13 + $0xb0] sm:$0xff] }
 0x10c   : > { %1720 = vmatpush3.msra.mxu0 %v804_v36  ;;  %1658 = vmatprep.subr.mxu1 %v428_v37  ;;  %v1030_v36 = vld [vmem:[#allocation13 + $0x18] sm:$0xff] }
 0x10d   : > { %1721 = vmatprep.subr.mxu0 %v803_v38  ;;  %1659 = vmatpush3.msra.mxu1 %v428_v37 }
 0x10e   : > { %1722 = vmatpush3.msra.mxu0 %v803_v38  ;;  %1660 = vmatprep.subr.mxu1 %v427_v39 }
 0x10f   : > { %1723 = vmatprep.subr.mxu0 %v802_v40  ;;  %1661 = vmatpush3.msra.mxu1 %v427_v39 }
 0x110   : > { %1724 = vmatpush3.msra.mxu0 %v802_v40  ;;  %1662 = vmatprep.subr.mxu1 %v426_v41 }
 0x111   : > { %1725 = vmatprep.subr.mxu0 %v801_v42  ;;  %1663 = vmatpush3.msra.mxu1 %v426_v41 }
 0x112   : > { %1726 = vmatpush3.msra.mxu0 %v801_v42  ;;  %1664 = vmatprep.subr.mxu1 %v425_v43 }
 0x113   : > { %1727 = vmatprep.subr.mxu0 %v800_v44  ;;  %1665 = vmatpush3.msra.mxu1 %v425_v43 }
 0x114   : > { %1728 = vmatpush3.msra.mxu0 %v800_v44  ;;  %1666 = vmatprep.subr.mxu1 %v424_v45 }
 0x115   : > { %1729 = vmatprep.subr.mxu0 %v799_v46  ;;  %1667 = vmatpush3.msra.mxu1 %v424_v45 }
 0x116   : > { %1670 = vmatprep.mubr.msk.f32.mxu1 %vm380_vm0, %v421_v47  ;;  %1730 = vmatpush3.msra.mxu0 %v799_v46 }
 0x117   : > { %1733 = vmatprep.mubr.msk.f32.mxu0 %vm380_vm0, %v795_v48  ;;  %1668 = vmatprep.subr.mxu1 %v423_v49 }
 0x118   : > { %1731 = vmatprep.subr.mxu0 %v798_v50  ;;  %1669 = vmatpush3.msra.mxu1 %v423_v49 }
 0x119   : > { %1732 = vmatpush3.msra.mxu0 %v798_v50  ;;  %1671 = vmatmul.mubr.msk.f32.vlgmr.msra.gmra.mxu1 %vm380_vm0, %v422_v53 }
 0x11a   : > { %1694 = vmatprep.subr.mxu1 %v711_v51  ;;  %1734 = vmatmul.mubr.msk.f32.vlgmr.msra.gmra.mxu0 %vm380_vm0, %v796_v52  ;;  %v1029_v52 = vld [vmem:[#allocation13 + $0x10] sm:$0xff] }
 0x11b   : > { %1695 = vmatpush3.msra.mxu1 %v711_v51  ;;  %1712 = vmatprep.mubr.msk.f32.mxu1 %vm380_vm0, %v700_v55  ;;  %v1028_v55 = vld [vmem:[#allocation13 + $0x8] sm:$0xff] }
 0x11c   : > { %1696 = vmatprep.subr.mxu1 %v710_v54  ;;  %1091 = vmatprep.subr.mxu0 %v2064_v0 }
 0x11d   : > { %1697 = vmatpush3.msra.mxu1 %v710_v54  ;;  %1092 = vmatpush1.msra.mxu0 %v1065_v14  ;;  %v1053_v54 = vld [vmem:[#allocation13 + $0xa8] sm:$0xff] }
 0x11e   : > { %1698 = vmatprep.subr.mxu1 %v709_v56  ;;  %1093 = vmatprep.subr.mxu0 %v2064_v0 }
 0x11f   : > { %1699 = vmatpush3.msra.mxu1 %v709_v56  ;;  %1094 = vmatpush1.msra.mxu0 %v1064_v15  ;;  %v1052_v56 = vld [vmem:[#allocation13 + $0xa0] sm:$0xff] }
 0x120   : > { %1700 = vmatprep.subr.mxu1 %v708_v57  ;;  %1095 = vmatprep.subr.mxu0 %v2064_v0 }
 0x121   : > { %1701 = vmatpush3.msra.mxu1 %v708_v57  ;;  %1096 = vmatpush1.msra.mxu0 %v1063_v17 }
 0x122   : > { %1702 = vmatprep.subr.mxu1 %v707_v58  ;;  %1097 = vmatprep.subr.mxu0 %v2064_v0 }
 0x123   : > { %1703 = vmatpush3.msra.mxu1 %v707_v58  ;;  %1098 = vmatpush1.msra.mxu0 %v1062_v19 }
 0x124   : > { %1704 = vmatprep.subr.mxu1 %v706_v59  ;;  %1099 = vmatprep.subr.mxu0 %v2064_v0 }
 0x125   : > { %1705 = vmatpush3.msra.mxu1 %v706_v59  ;;  %1100 = vmatpush1.msra.mxu0 %v1061_v21  ;;  %v1549_v59 = vld [vmem:[%s2504_s4] ss:$0 sm:$0xff] }
 0x126   : > { %1706 = vmatprep.subr.mxu1 %v705_v60  ;;  %1101 = vmatprep.subr.mxu0 %v2064_v0 }
 0x127   : > { %1707 = vmatpush3.msra.mxu1 %v705_v60  ;;  %1102 = vmatpush1.msra.mxu0 %v1060_v23 }
 0x128   : > { %1708 = vmatprep.subr.mxu1 %v704_v61  ;;  %1103 = vmatprep.subr.mxu0 %v2064_v0 }
 0x129   : > { %1709 = vmatpush3.msra.mxu1 %v704_v61  ;;  %1104 = vmatpush1.msra.mxu0 %v1059_v25 }
 0x12a   : > { %1710 = vmatprep.subr.mxu1 %v703_v62  ;;  %1105 = vmatprep.subr.mxu0 %v2064_v0 }
 0x12b   : > { %1711 = vmatpush3.msra.mxu1 %v703_v62  ;;  %1106 = vmatpush1.msra.mxu0 %v1058_v27 }
 0x12c   : > { %1713 = vmatmul.mubr.msk.f32.vlgmr.msra.gmra.mxu1 %vm380_vm0, %v701_v1  ;;  %1736 = vmatprep.subr.mxu1 %v901_v63  ;;  %v1051_v1 = vld [vmem:[#allocation13 + $0x98] sm:$0xff] }
 0x12d   : > { %1737 = vmatpush3.msra.mxu1 %v901_v63  ;;  %1754 = vmatprep.mubr.msk.f32.mxu1 %vm380_vm0, %v890_v3  ;;  %v1027_v63 = vld [vmem:[#allocation13] sm:$0xff] }
 0x12e   : > { %1738 = vmatprep.subr.mxu1 %v900_v2  ;;  %1107 = vmatprep.subr.mxu0 %v2064_v0 }
 0x12f   : > { %1739 = vmatpush3.msra.mxu1 %v900_v2  ;;  %1108 = vmatpush1.msra.mxu0 %v1057_v29  ;;  %v1044_v2 = vld [vmem:[#allocation13 + $0x88] sm:$0xff] }
 0x130   : > { %1740 = vmatprep.subr.mxu1 %v899_v4  ;;  %1109 = vmatprep.subr.mxu0 %v2064_v0 }
 0x131   : > { %1741 = vmatpush3.msra.mxu1 %v899_v4  ;;  %1110 = vmatpush1.msra.mxu0 %v1056_v31  ;;  %v1266_v31 = vld [vmem:[#allocation13 + $0x198] sm:$0xff] }
 0x132   : > { %1742 = vmatprep.subr.mxu1 %v898_v5  ;;  %1111 = vmatprep.subr.mxu0 %v2064_v0 }
 0x133   : > { %1743 = vmatpush3.msra.mxu1 %v898_v5  ;;  %1112 = vmatpush1.msra.mxu0 %v1055_v33  ;;  %v1050_v5 = vld [vmem:[#allocation13 + $0x90] sm:$0xff] }
 0x134   : > { %1744 = vmatprep.subr.mxu1 %v897_v6  ;;  %1113 = vmatprep.subr.mxu0 %v2064_v0 }
 0x135   : > { %1745 = vmatpush3.msra.mxu1 %v897_v6  ;;  %1114 = vmatpush1.msra.mxu0 %v1054_v35  ;;  %v1043_v6 = vld [vmem:[#allocation13 + $0x80] sm:$0xff] }
 0x136   : > { %1746 = vmatprep.subr.mxu1 %v896_v7  ;;  %1115 = vmatprep.subr.mxu0 %v2064_v0 }
 0x137   : > { %1747 = vmatpush3.msra.mxu1 %v896_v7  ;;  %1116 = vmatpush1.msra.mxu0 %v1053_v54  ;;  %v1252_v54 = vld [vmem:[#allocation13 + $0x128] sm:$0xff] }
 0x138   : > { %1748 = vmatprep.subr.mxu1 %v895_v8  ;;  %1117 = vmatprep.subr.mxu0 %v2064_v0 }
 0x139   : > { %1749 = vmatpush3.msra.mxu1 %v895_v8  ;;  %1118 = vmatpush1.msra.mxu0 %v1052_v56 }
 0x13a   : > { %1750 = vmatprep.subr.mxu1 %v894_v9  ;;  %1119 = vmatprep.subr.mxu0 %v2064_v0 }
 0x13b   : > { %1751 = vmatpush3.msra.mxu1 %v894_v9  ;;  %1120 = vmatpush1.msra.mxu0 %v1051_v1  ;;  %v1067_v9 = vld [vmem:[#allocation13 + $0x118] sm:$0xff] }
 0x13c   : > { %1752 = vmatprep.subr.mxu1 %v893_v10  ;;  %1121 = vmatprep.subr.mxu0 %v2064_v0 }
 0x13d   : > { %1753 = vmatpush3.msra.mxu1 %v893_v10  ;;  %1122 = vmatpush1.msra.mxu0 %v1050_v5 }
 0x13e   : > { %1755 = vmatmul.mubr.msk.f32.vlgmr.msra.gmra.mxu1 %vm380_vm0, %v891_v11  ;;  %1171 = vmatprep.subr.mxu1 %v2064_v0  ;;  %v1066_v11 = vld [vmem:[#allocation13 + $0x110] sm:$0xff] }
 0x13f   : > { %1172 = vmatpush1.msra.mxu1 %v1042_v12  ;;  %1151 = vmatprep.subr.mxu0 %v2064_v0 }
 0x140   : > { %1173 = vmatprep.subr.mxu1 %v2064_v0  ;;  %1152 = vmatpush2.msra.mxu0 %v1067_v9 }
 0x141   : > { %1174 = vmatpush1.msra.mxu1 %v1041_v13  ;;  %1153 = vmatprep.subr.mxu0 %v2064_v0 }
 0x142   : > { %1175 = vmatprep.subr.mxu1 %v2064_v0  ;;  %1154 = vmatpush2.msra.mxu0 %v1066_v11 }
 0x143   : > { %1176 = vmatpush1.msra.mxu1 %v1040_v16  ;;  %1290 = vmatprep.subr.mxu0 %v2064_v0 }
 0x144   : > { %1177 = vmatprep.subr.mxu1 %v2064_v0 }
 0x145   : > { %1178 = vmatpush1.msra.mxu1 %v1039_v18 }
 0x146   : > { %1179 = vmatprep.subr.mxu1 %v2064_v0 }
 0x147   : > { %1180 = vmatpush1.msra.mxu1 %v1038_v20 }
 0x148   : > { %1181 = vmatprep.subr.mxu1 %v2064_v0 }
 0x149   : > { %1182 = vmatpush1.msra.mxu1 %v1037_v22 }
 0x14a   : > { %1183 = vmatprep.subr.mxu1 %v2064_v0 }
 0x14b   : > { %1184 = vmatpush1.msra.mxu1 %v1036_v24 }
 0x14c   : > { %1185 = vmatprep.subr.mxu1 %v2064_v0 }
 0x14d   : > { %1186 = vmatpush1.msra.mxu1 %v1035_v26 }
 0x14e   : > { %1187 = vmatprep.subr.mxu1 %v2064_v0 }
 0x14f   : > { %1188 = vmatpush1.msra.mxu1 %v1034_v28 }
 0x150   : > { %1189 = vmatprep.subr.mxu1 %v2064_v0 }
 0x151   : > { %1190 = vmatpush1.msra.mxu1 %v1033_v30 }
 0x152   : > { %1191 = vmatprep.subr.mxu1 %v2064_v0 }
 0x153   : > { %1192 = vmatpush1.msra.mxu1 %v1032_v32 }
 0x154   : > { %1193 = vmatprep.subr.mxu1 %v2064_v0 }
 0x155   : > { %1194 = vmatpush1.msra.mxu1 %v1031_v34 }
 0x156   : > { %1195 = vmatprep.subr.mxu1 %v2064_v0 }
 0x157   : > { %1196 = vmatpush1.msra.mxu1 %v1030_v36 }
 0x158   : > { %1197 = vmatprep.subr.mxu1 %v2064_v0 }
 0x159   : > { %1198 = vmatpush1.msra.mxu1 %v1029_v52  ;;  %v1254_v52 = vld [vmem:[#allocation13 + $0x138] sm:$0xff] }
 0x15a   : > { %1199 = vmatprep.subr.mxu1 %v2064_v0 }
 0x15b   : > { %1200 = vmatpush1.msra.mxu1 %v1028_v55  ;;  %v1251_v55 = vld [vmem:[#allocation13 + $0x120] sm:$0xff] }
 0x15c   : > { %1201 = vmatprep.subr.mxu1 %v2064_v0 }
 0x15d   : > { %1202 = vmatpush1.msra.mxu1 %v1027_v63 }
 0x15e   : > { %1231 = vmatprep.subr.mxu1 %v2064_v0 }
 0x15f   : > { %1232 = vmatpush2.msra.mxu1 %v1044_v2 }
 0x160   : > { %1233 = vmatprep.subr.mxu1 %v2064_v0 }
 0x161   : > { %1234 = vmatpush2.msra.mxu1 %v1043_v6 }
 0x1c6   : > { %v1651_v37 = vpop.f32.mrf.mxu1 }
 0x1c7   : > { %v1693_v40 = vpop.f32.mrf.mxu0 }
 0x1c8   : > { %v515_v38 = vpop.f32.mrf.mxu1 }
 0x1c9   : > { %v689_v45 = vpop.f32.mrf.mxu0 }
 0x1d9   : > { %v1672_v39 = vpop.f32.mrf.mxu1 }
 0x1da   : > { %v602_v42 = vadd.f32 %v1672_v39, %v1651_v37  ;;  %v1735_v50 = vpop.f32.mrf.mxu0  ;;  %v1265_v37 = vld [vmem:[#allocation13 + $0x190] sm:$0xff] }
 0x1db   : > { %v596_v41 = vpop.f32.mrf.mxu1 }
 0x1dc   : > { %v597_v44 = vadd.f32 %v596_v41, %v515_v38  ;;  %v699_v46 = vadd.f32 %v1693_v40, %v602_v42  ;;  %v879_v57 = vpop.f32.mrf.mxu0  ;;  %v1264_v40 = vld [vmem:[#allocation13 + $0x188] sm:$0xff] }
 0x1de   : > { %v698_v49 = vadd.f32 %v689_v45, %v597_v44  ;;  %v1262_v44 = vld [vmem:[#allocation13 + $0x178] sm:$0xff]  ;;  %v1261_v45 = vld [vmem:[#allocation13 + $0x170] sm:$0xff] }
 0x1ec   : > { %v1714_v43 = vpop.f32.mrf.mxu1 }
 0x1ed   : > { %v794_v48 = vadd.f32 %v1714_v43, %v699_v46  ;;  %v1263_v43 = vld [vmem:[#allocation13 + $0x180] sm:$0xff]  ;;  %v1260_v46 = vld [vmem:[#allocation13 + $0x168] sm:$0xff] }
 0x1ee   : > { %v784_v47 = vpop.f32.mrf.mxu1 }
 0x1ef   : > { %v793_v51 = vadd.f32 %v784_v47, %v698_v49  ;;  %v889_v53 = vadd.f32 %v1735_v50, %v794_v48  ;;  %v1259_v47 = vld [vmem:[#allocation13 + $0x160] sm:$0xff]  ;;  %v1258_v48 = vld [vmem:[#allocation13 + $0x158] sm:$0xff]  ;;  %v1257_v49 = vld [vmem:[#allocation13 + $0x150] sm:$0xff] }
 0x1f0   : > { %v1256_v50 = vld [vmem:[#allocation13 + $0x148] sm:$0xff] }
 0x1f1   : > { %v888_v61 = vadd.f32 %v879_v57, %v793_v51  ;;  %v1255_v51 = vld [vmem:[#allocation13 + $0x140] sm:$0xff] }
 0x1fe   : > { %v1756_v58 = vpop.f32.mrf.mxu1 }
 0x1ff   : > { %v984_v60 = vadd.f32 %v1756_v58, %v889_v53  ;;  %v1253_v53 = vld [vmem:[#allocation13 + $0x130] sm:$0xff]  ;;  %v1268_v58 = vld [vmem:[#allocation13 + $0x1a8] sm:$0xff] }
 0x200   : > { %v974_v62 = vpop.f32.mrf.mxu1 }
 0x201   : > { %v993_v3 = vadd.f32 %v1549_v59, %v984_v60  ;;  %v983_v4 = vadd.f32 %v974_v62, %v888_v61  ;;  %v1267_v61 = vld [vmem:[#allocation13 + $0x1a0] sm:$0xff] }
 0x203   : > { %v995_v7 = vmax.f32 %v993_v3, 0.0  ;;  %v992_v8 = vadd.f32 %v1549_v59, %v983_v4 }
 0x205   : > { %v994_v10 = vmax.f32 %v992_v8, 0.0  ;;  %v1000_v12 = vrot.slane %v995_v7, 7 }
 0x207   : > { %v999_v13 = vrot.slane %v994_v10, 7 }
 0x209   : > { %1002 = vrot.lane.b32.xlu0 %v999_v13, %s2066_s15  ;;  %v1001_v14 = vsel %vm998_vm5, %v999_v13, %v1000_v12 }
 0x20a   : > { %1004 = vrot.lane.b32.xlu1 %v1001_v14, %s2066_s15  ;;  %v1556_v14 = vld [vmem:[%s2506_s6] ss:$0 sm:$0xff] }
 0x20d   : > { %1006 = vrot.lane.b32.xlu0 %v1000_v12, %s2066_s15 }
 0x27b   : > { %v1003_v15 = vpop.permute.xlu0 %1002 }
 0x27c   : > { %1012 = vst.msk [vmem:[#allocation4] sm:$0xfe] %vm1011_vm6, %v1003_v15  ;;  %v1005_v16 = vpop.permute.xlu1 %1004 }
 0x27d   : > { %1014 = vst.msk [vmem:[#allocation4 + $0x8] sm:$0xfe] %vm1013_vm7, %v1003_v15 }
 0x27e   : > { %1016 = vst.msk [vmem:[#allocation4 + $0x10] sm:$0xff] %vm1015_vm8, %v1005_v16 }
 0x27f   : > { %1018 = vst.msk [vmem:[#allocation4 + $0x18] sm:$0xff] %vm1017_vm9, %v1005_v16  ;;  %v1007_v17 = vpop.permute.xlu0 %1006 }
 0x280   : > { %1020 = vst.msk [vmem:[#allocation4 + $0x20] sm:$0x1] %vm1019_vm10, %v1007_v17 }
 0x281   : > { %1022 = vst.msk [vmem:[#allocation4 + $0x28] sm:$0x1] %vm1021_vm11, %v1007_v17 }
 0x283   : > { %v1023_v19 = vld [vmem:[#allocation4] sm:$0xff] }
 0x284   : > { %v1024_v18 = vld [vmem:[#allocation4 + $0x8] sm:$0xff]  ;;  %v1045_v24 = vld [vmem:[#allocation4] sm:$0xfe] }
 0x285   : > { %v1046_v20 = vld [vmem:[#allocation4 + $0x8] sm:$0xfe]  ;;  %1552 = vmatprep.mubr.msk.f32.mxu1 %vm389_vm3, %v1024_v18  ;;  %v2404_v23 = vld [vmem:[#allocation4 + $0x10] sm:$0xff]  ;;  %v1075_v26 = vrot.slane %v1045_v24, 1  ;;  %v1246_v56 = vld [vmem:[#allocation4] sm:$0xfc] }
 0x286   : > { %v2402_v21 = vld [vmem:[#allocation4 + $0x18] sm:$0xff]  ;;  %v1078_v22 = vrot.slane %v1046_v20, 1  ;;  %1236 = vmatmul.mubr.f32.vlgmr.msra.gmra.mxu1 %v1023_v19  ;;  %v1076_v27 = vrot.slane %v2404_v23, 1  ;;  %v1247_v28 = vld [vmem:[#allocation4 + $0x8] sm:$0xfc]  ;;  %v1274_v59 = vrot.slane %v1246_v56, 2 }
 0x287   : > { %v1079_v25 = vrot.slane %v2402_v21, 1  ;;  %1553 = vmatprep.mubr.msk.f32.mxu1 %vm389_vm3, %v2402_v21  ;;  %v1047_v33 = vld [vmem:[#allocation4 + $0x20] sm:$0x1]  ;;  %v1278_v36 = vrot.slane %v2402_v21, 2  ;;  %v1277_v38 = vrot.slane %v1247_v28, 2  ;;  %v1275_v60 = vrot.slane %v2404_v23, 2 }
 0x288   : > { %v1077_v30 = vsel %vm1074_vm12, %v1075_v26, %v1076_v27  ;;  %v1048_v32 = vld [vmem:[#allocation4 + $0x28] sm:$0x1]  ;;  %v1081_v35 = vrot.slane %v1047_v33, 1  ;;  %v1248_v63 = vld [vmem:[#allocation4 + $0x20] sm:$0x3] }
 0x289   : > { %v1080_v29 = vsel %vm1074_vm12, %v1078_v22, %v1079_v25  ;;  %v1083_v34 = vrot.slane %v1048_v32, 1  ;;  %v1279_v42 = vsel %vm1273_vm13, %v1277_v38, %v1278_v36  ;;  %v1249_v57 = vld [vmem:[#allocation4 + $0x28] sm:$0x3]  ;;  %v1276_v1 = vsel %vm1273_vm13, %v1274_v59, %v1275_v60 }
 0x28a   : > { %1550 = vmatprep.mubr.msk.f32.mxu0 %vm389_vm3, %v1080_v29  ;;  %1241 = vmatmul.mubr.f32.gmra.mxu1 %v2404_v23  ;;  %v1082_v41 = vsel %vm1074_vm12, %v1076_v27, %v1081_v35  ;;  %v1282_v62 = vrot.slane %v1249_v57, 2  ;;  %v1280_v2 = vrot.slane %v1248_v63, 2 }
 0x28b   : > { %1156 = vmatmul.mubr.f32.vlgmr.msra.gmra.mxu0 %v1077_v30  ;;  %v1084_v39 = vsel %vm1074_vm12, %v1079_v25, %v1083_v34 }
 0x28c   : > { %1291 = vmatpush1.msra.mxu0 %v1266_v31  ;;  %1551 = vmatprep.mubr.msk.f32.mxu0 %vm389_vm3, %v1084_v39  ;;  %v1283_v3 = vsel %vm1273_vm13, %v1278_v36, %v1282_v62  ;;  %v1281_v4 = vsel %vm1273_vm13, %v1275_v60, %v1280_v2 }
 0x28d   : > { %1292 = vmatprep.subr.mxu0 %v2064_v0 }
 0x28e   : > { %1293 = vmatpush1.msra.mxu0 %v1265_v37 }
 0x28f   : > { %1294 = vmatprep.subr.mxu0 %v2064_v0  ;;  %1161 = vmatmul.mubr.f32.gmra.mxu0 %v1082_v41 }
 0x290   : > { %1295 = vmatpush1.msra.mxu0 %v1264_v40  ;;  %1554 = vmatprep.mubr.msk.f32.mxu0 %vm389_vm3, %v1279_v42 }
 0x291   : > { %1296 = vmatprep.subr.mxu0 %v2064_v0 }
 0x292   : > { %1297 = vmatpush1.msra.mxu0 %v1263_v43 }
 0x293   : > { %1298 = vmatprep.subr.mxu0 %v2064_v0 }
 0x294   : > { %1299 = vmatpush1.msra.mxu0 %v1262_v44 }
 0x295   : > { %1300 = vmatprep.subr.mxu0 %v2064_v0 }
 0x296   : > { %1301 = vmatpush1.msra.mxu0 %v1261_v45 }
 0x297   : > { %1302 = vmatprep.subr.mxu0 %v2064_v0 }
 0x298   : > { %1303 = vmatpush1.msra.mxu0 %v1260_v46 }
 0x299   : > { %1304 = vmatprep.subr.mxu0 %v2064_v0 }
 0x29a   : > { %1305 = vmatpush1.msra.mxu0 %v1259_v47 }
 0x29b   : > { %1306 = vmatprep.subr.mxu0 %v2064_v0 }
 0x29c   : > { %1307 = vmatpush1.msra.mxu0 %v1258_v48 }
 0x29d   : > { %1308 = vmatprep.subr.mxu0 %v2064_v0 }
 0x29e   : > { %1309 = vmatpush1.msra.mxu0 %v1257_v49 }
 0x29f   : > { %1310 = vmatprep.subr.mxu0 %v2064_v0 }
 0x2a0   : > { %1311 = vmatpush1.msra.mxu0 %v1256_v50 }
 0x2a1   : > { %1312 = vmatprep.subr.mxu0 %v2064_v0 }
 0x2a2   : > { %1313 = vmatpush1.msra.mxu0 %v1255_v51 }
 0x2a3   : > { %1314 = vmatprep.subr.mxu0 %v2064_v0 }
 0x2a4   : > { %1315 = vmatpush1.msra.mxu0 %v1254_v52 }
 0x2a5   : > { %1316 = vmatprep.subr.mxu0 %v2064_v0 }
 0x2a6   : > { %1317 = vmatpush1.msra.mxu0 %v1253_v53 }
 0x2a7   : > { %1318 = vmatprep.subr.mxu0 %v2064_v0 }
 0x2a8   : > { %1319 = vmatpush1.msra.mxu0 %v1252_v54 }
 0x2a9   : > { %1320 = vmatprep.subr.mxu0 %v2064_v0 }
 0x2aa   : > { %1321 = vmatpush1.msra.mxu0 %v1251_v55 }
 0x2ab   : > { %1350 = vmatprep.subr.mxu0 %v2064_v0 }
 0x2ac   : > { %1351 = vmatpush2.msra.mxu0 %v1268_v58 }
 0x2ad   : > { %1352 = vmatprep.subr.mxu0 %v2064_v0 }
 0x2ae   : > { %1353 = vmatpush2.msra.mxu0 %v1267_v61 }
 0x2af   : > { %1355 = vmatmul.mubr.f32.vlgmr.msra.gmra.mxu0 %v1276_v1 }
 0x2b0   : > { %1555 = vmatprep.mubr.msk.f32.mxu0 %vm389_vm3, %v1283_v3 }
 0x2b3   : > { %1360 = vmatmul.mubr.f32.gmra.mxu0 %v1281_v4 }
 0x346   : > { %v1237_v5 = vpop.f32.mrf.mxu1 }
 0x348   : > { %v1239_v6 = vpop.f32.mrf.mxu1 }
 0x34a   : > { %v1242_v8 = vpop.f32.mrf.mxu1 }
 0x34b   : > { %v1157_v7 = vpop.f32.mrf.mxu0 }
 0x34c   : > { %v1244_v9 = vpop.f32.mrf.mxu1  ;;  %v1238_v12 = vadd.f32 %v1237_v5, %v1157_v7 }
 0x34d   : > { %v1159_v0 = vpop.f32.mrf.mxu0 }
 0x34f   : > { %v1162_v10 = vpop.f32.mrf.mxu0 }
 0x350   : > { %v1243_v17 = vadd.f32 %v1242_v8, %v1162_v10 }
 0x351   : > { %v1164_v11 = vpop.f32.mrf.mxu0 }
 0x36f   : > { %v1356_v13 = vpop.f32.mrf.mxu0 }
 0x370   : > { %v1365_v15 = vadd.f32 %v1356_v13, %v1238_v12 }
 0x371   : > { %v1358_v16 = vpop.f32.mrf.mxu0 }
 0x372   : > { %v1374_v18 = vadd.f32 %v1556_v14, %v1365_v15 }
 0x373   : > { %v1361_v19 = vpop.f32.mrf.mxu0 }
 0x374   : > { %v1376_v20 = vmax.f32 %v1374_v18, 0.0  ;;  %v1366_v21 = vadd.f32 %v1361_v19, %v1243_v17 }
 0x375   : > { %v1363_v22 = vpop.f32.mrf.mxu0 }
 0x376   : > { %1378 = vst [vmem:[%s379_s2] sm:$0xff] %v1376_v20  ;;  %v1375_v23 = vadd.f32 %v1556_v14, %v1366_v21 }
 0x378   : > { %v1377_v24 = vmax.f32 %v1375_v23, 0.0 }
 0x37a   : > { %1379 = vst [vmem:[%s379_s2 + $0x8] sm:$0xff] %v1377_v24 }
 0x37b   : > { %1992 = shalt.err (!%p1989_p6)
}
 0x37c   : > { %s1993_s9 = scalar_lea.hbm %s2456_s13, 256  ;;  %s1997_s30 = scalar_lea.hbm %s2507_s7, 512 }
 0x37d   : > { %p1994_p7 = scmp.ne.s32.totalorder %s2456_s13, %s1993_s9  ;;  %p1998_p11 = scmp.lt.s32.totalorder %s2456_s13, %s2507_s7 }
 0x37e   : > { %p1999_p3 = scmp.lt.s32.totalorder %s1997_s30, %s1993_s9 }
 0x37f   : > { %p1995_p5 = pnand %p1994_p7, %p2539_p13 }
 0x380   : > { %p2000_p12 = por %p1999_p3, %p1998_p11 }
 0x381   : > { %p1996_p8 = pneg %p1995_p5 }
 0x383   : > { %p2001_p9 = pnand %p2000_p12, %p1996_p8 }
 0x385   : > { %2004 = shalt.err (!%p2001_p9)
}
 0x386   : > { %s2068_s11 = smov 128  }
 0x387   : > { %1773 = dma.vmem_to_hbm [thread:$0]  (%p2539_p13), %s2451_s21, 256, %s2456_s13, %s1381_s29, %s2068_s11, %s2068_s11, %s2066_s15  }
 0x388 PF: > { %s1409_s18 = sand.u32 1, %s2043_s24   ;;  %p2540_p0 = scmp.ne.s32.totalorder %s2522_s8, 0 }
 0x389   : > { %p2541_p2 = scmp.ge.s32.totalorder %s2055_s27, 2  ;;  %s1410_s2 = scalar_lea.sflag [#allocation7], %s1409_s18 }
 0x38b   : > { %p1793_p10 = pnand %p2541_p2, %p2540_p0 }
 0x38d   : > { %p1794_p1 = pneg %p1793_p10 }
 0x38f   : > { %2038 = dma.done.wait (%p1794_p1), %s1410_s2, 256  }
 0x390   : > { %2040 = vsyncadd (%p1794_p1), %s1410_s2, 4294967040  ;;  %s2542_s20 = sld [smem:[#allocation20_spill]]  ;;  %p24_p4 = scmp.ge.s32.totalorder %s2198_s14, 4  }
 0x391   : > { %s2543_s26 = sld [smem:[#allocation21_spill]]  ;;  %s2544_s24 = smov %s2047_s25 }
 0x392   : > { %s2546_s27 = smov %s2198_s14  ;;  %26 = sbr.rel (!%p24_p4) target bundleno = 13 (0xd), region = 124 }
 0x396   : > { %s2545_s25 = smov %s2542_s20 }
 0x397   :  { %1415 = vsyncpa [#allocation6], 1 }
 0x398   :  { %1417 = vsyncpa [#allocation6 + $0x1], 1 }
 0x399   :  { %1418 = vsyncpa [#allocation9], 1 }
 0x39a   :  { %1420 = vsyncpa [#allocation9 + $0x1], 1 }
 0x39b   :  { %1421 = vsyncpa [#allocation12], 1 }
 0x39c   :  { %1422 = vsyncpa [#allocation7], 1 }
 0x39d   :  { %1424 = vsyncpa [#allocation7 + $0x1], 1 }

</bundles_post_ra>
